<compile_context>
chip_gen: v7x
topology: tpu7x:2x2x1
jax: 0.10.0
libtpu: 0.0.40
codegen_flags: <defaults>
</compile_context>

<pallas_src>
import functools

import jax
import jax.numpy as jnp
from jax import lax
from jax.experimental import pallas as pl
from jax.experimental.pallas import tpu as pltpu

# MXU operand dtype (native bf16 on v5e/v6e/v7x). Accumulation / norm / softmax stay f32.
MXU_DTYPE = jnp.bfloat16

# Scoped-VMEM ceiling: raises v5e's 16 MiB default while staying within v7x's 64 MiB physical.
VMEM_LIMIT_BYTES = 64 * 1024 * 1024


# ------------------------------ tiling helper -------------------------------

def _pick_tile(dim, target, aligns):
    """Largest divisor of `dim` that is <= target and a multiple of one of `aligns`
    (tried in order; 256-first favours the v6e/v7x 256-wide MXU).  Falls back to the
    full extent, which is always a legal block shape."""
    if dim <= target:
        return dim
    for align in aligns:
        t = (target // align) * align
        while t >= align:
            if dim % t == 0:
                return t
            t -= align
    return dim


def _mosaic_params(semantics):
    return pltpu.CompilerParams(dimension_semantics=semantics,
                                vmem_limit_bytes=VMEM_LIMIT_BYTES)


# ----------------------------- Pallas kernels -------------------------------

def _linear_kernel(x_ref, w_ref, b_ref, o_ref, acc_ref):
    """One (tm, tn) output tile; bf16 MXU operands, f32 accumulation over the K grid axis."""
    k = pl.program_id(2)

    @pl.when(k == 0)
    def _():
        acc_ref[...] = jnp.zeros_like(acc_ref)

    acc_ref[...] += jnp.dot(x_ref[...].astype(MXU_DTYPE), w_ref[...].astype(MXU_DTYPE),
                            preferred_element_type=jnp.float32)

    @pl.when(k == pl.num_programs(2) - 1)
    def _():
        o_ref[...] = (acc_ref[...] + b_ref[...].astype(jnp.float32)).astype(o_ref.dtype)


def _linear_residual_kernel(x_ref, w_ref, b_ref, r_ref, o_ref, acc_ref):
    """Same as _linear_kernel but fuses `+ residual` into the final-k writeback."""
    k = pl.program_id(2)

    @pl.when(k == 0)
    def _():
        acc_ref[...] = jnp.zeros_like(acc_ref)

    acc_ref[...] += jnp.dot(x_ref[...].astype(MXU_DTYPE), w_ref[...].astype(MXU_DTYPE),
                            preferred_element_type=jnp.float32)

    @pl.when(k == pl.num_programs(2) - 1)
    def _():
        o_ref[...] = (acc_ref[...] + b_ref[...].astype(jnp.float32)
                      + r_ref[...].astype(jnp.float32)).astype(o_ref.dtype)


def linear(x, w, b, residual=None):
    """x: (M, K), w: (K, N) [bf16 ok], b: (N,) -> (M, N). y = x @ w + b (+ residual)."""
    M, K = x.shape
    N = w.shape[1]
    tm = _pick_tile(M, 256, (256, 16, 8))
    tn = _pick_tile(N, 1024, (256, 128))
    tk = _pick_tile(K, 1024, (256, 128))
    grid = (M // tm, N // tn, K // tk)

    in_specs = [
        pl.BlockSpec((tm, tk), lambda i, j, k: (i, k)),
        pl.BlockSpec((tk, tn), lambda i, j, k: (k, j)),
        pl.BlockSpec((1, tn), lambda i, j, k: (0, j)),
    ]
    args = [x, w, b.reshape(1, N)]
    kernel = _linear_kernel
    if residual is not None:
        # Residual block index is k-invariant -> stays VMEM-resident, no re-DMA across k.
        in_specs.append(pl.BlockSpec((tm, tn), lambda i, j, k: (i, j)))
        args.append(residual)
        kernel = _linear_residual_kernel

    return pl.pallas_call(
        kernel,
        out_shape=jax.ShapeDtypeStruct((M, N), x.dtype),
        grid=grid,
        in_specs=in_specs,
        out_specs=pl.BlockSpec((tm, tn), lambda i, j, k: (i, j)),
        scratch_shapes=[pltpu.VMEM((tm, tn), jnp.float32)],
        compiler_params=_mosaic_params(("parallel", "parallel", "arbitrary")),
    )(*args)


def _rms(x_f32, gamma_f32, eps):
    var = jnp.mean(x_f32 * x_f32, axis=-1, keepdims=True)
    return (x_f32 * lax.rsqrt(var + eps)) * gamma_f32


def _norm_qkv_rope_kernel(x_ref, g_ref, wq_ref, wk_ref, wv_ref,
                          bq_ref, bk_ref, bv_ref, cos_ref, sin_ref,
                          q_ref, k_ref, v_ref, *, eps, n_heads, n_kv, head_dim):
    """norm1 + q/k/v projections + RoPE in one kernel (activation read once from HBM)."""
    xn = _rms(x_ref[...].astype(jnp.float32), g_ref[...].astype(jnp.float32), eps)
    xn = xn.astype(MXU_DTYPE)
    q = jnp.dot(xn, wq_ref[...].astype(MXU_DTYPE),
                preferred_element_type=jnp.float32) + bq_ref[...].astype(jnp.float32)
    k = jnp.dot(xn, wk_ref[...].astype(MXU_DTYPE),
                preferred_element_type=jnp.float32) + bk_ref[...].astype(jnp.float32)
    v = jnp.dot(xn, wv_ref[...].astype(MXU_DTYPE),
                preferred_element_type=jnp.float32) + bv_ref[...].astype(jnp.float32)

    cos = cos_ref[...].astype(jnp.float32)     # (tm, Dh)
    sin = sin_ref[...].astype(jnp.float32)
    half = head_dim // 2

    def rope(t, nh):
        # per-head static lane slices (no reshapes); heads re-packed lane-dense via concat.
        heads = []
        for h in range(nh):
            th = t[:, h * head_dim:(h + 1) * head_dim]
            t_rot = jnp.concatenate([-th[:, half:], th[:, :half]], axis=-1)
            heads.append(th * cos + t_rot * sin)
        return jnp.concatenate(heads, axis=-1)

    q_ref[...] = rope(q, n_heads).astype(q_ref.dtype)
    k_ref[...] = rope(k, n_kv).astype(k_ref.dtype)
    v_ref[...] = v.astype(v_ref.dtype)


def norm_qkv_rope(x, norm_w, wq, bq, wk, bk, wv, bv, cos_flat, sin_flat,
                  eps, n_heads, n_kv, head_dim):
    M, H = x.shape
    Hq = wq.shape[1]
    Hkv = wk.shape[1]
    Dh = head_dim
    tm = _pick_tile(M, 512, (256, 16, 8))
    grid = (M // tm,)
    return pl.pallas_call(
        functools.partial(_norm_qkv_rope_kernel, eps=eps, n_heads=n_heads,
                          n_kv=n_kv, head_dim=head_dim),
        out_shape=(jax.ShapeDtypeStruct((M, Hq), x.dtype),
                   jax.ShapeDtypeStruct((M, Hkv), x.dtype),
                   jax.ShapeDtypeStruct((M, Hkv), x.dtype)),
        grid=grid,
        in_specs=[
            pl.BlockSpec((tm, H), lambda i: (i, 0)),
            pl.BlockSpec((1, H), lambda i: (0, 0)),
            pl.BlockSpec((H, Hq), lambda i: (0, 0)),
            pl.BlockSpec((H, Hkv), lambda i: (0, 0)),
            pl.BlockSpec((H, Hkv), lambda i: (0, 0)),
            pl.BlockSpec((1, Hq), lambda i: (0, 0)),
            pl.BlockSpec((1, Hkv), lambda i: (0, 0)),
            pl.BlockSpec((1, Hkv), lambda i: (0, 0)),
            pl.BlockSpec((tm, Dh), lambda i: (i, 0)),
            pl.BlockSpec((tm, Dh), lambda i: (i, 0)),
        ],
        out_specs=(pl.BlockSpec((tm, Hq), lambda i: (i, 0)),
                   pl.BlockSpec((tm, Hkv), lambda i: (i, 0)),
                   pl.BlockSpec((tm, Hkv), lambda i: (i, 0))),
        compiler_params=_mosaic_params(("parallel",)),
    )(x, norm_w.reshape(1, H), wq, wk, wv,
      bq.reshape(1, Hq), bk.reshape(1, Hkv), bv.reshape(1, Hkv), cos_flat, sin_flat)


def _norm_concat_linear_kernel(x1_ref, x2_ref, g_ref, w1_ref, w2_ref, b_ref, o_ref, *, eps):
    """[RMSNorm(x1), RMSNorm(x2)] @ [W1; W2] + b without materializing the concat."""
    g = g_ref[...].astype(jnp.float32)
    a = _rms(x1_ref[...].astype(jnp.float32), g, eps).astype(MXU_DTYPE)
    c = _rms(x2_ref[...].astype(jnp.float32), g, eps).astype(MXU_DTYPE)
    acc = jnp.dot(a, w1_ref[...].astype(MXU_DTYPE), preferred_element_type=jnp.float32)
    acc = acc + jnp.dot(c, w2_ref[...].astype(MXU_DTYPE), preferred_element_type=jnp.float32)
    o_ref[...] = (acc + b_ref[...].astype(jnp.float32)).astype(o_ref.dtype)


def norm_concat_linear(x1, x2, norm_w, w1, w2, b, eps):
    M, K = x1.shape
    N = w1.shape[1]
    tm = _pick_tile(M, 512, (256, 16, 8))
    tn = _pick_tile(N, 256, (256, 128))
    grid = (M // tm, N // tn)
    return pl.pallas_call(
        functools.partial(_norm_concat_linear_kernel, eps=eps),
        out_shape=jax.ShapeDtypeStruct((M, N), x1.dtype),
        grid=grid,
        in_specs=[
            pl.BlockSpec((tm, K), lambda i, j: (i, 0)),
            pl.BlockSpec((tm, K), lambda i, j: (i, 0)),
            pl.BlockSpec((1, K), lambda i, j: (0, 0)),
            pl.BlockSpec((K, tn), lambda i, j: (0, j)),
            pl.BlockSpec((K, tn), lambda i, j: (0, j)),
            pl.BlockSpec((1, tn), lambda i, j: (0, j)),
        ],
        out_specs=pl.BlockSpec((tm, tn), lambda i, j: (i, j)),
        compiler_params=_mosaic_params(("parallel", "parallel")),
    )(x1, x2, norm_w.reshape(1, K), w1, w2, b.reshape(1, N))


def _norm_gate_up_silu_kernel(x_ref, g_ref, wg_ref, wu_ref, bg_ref, bu_ref, o_ref, *, eps):
    """norm2 + gate_proj + up_proj + SiLU(gate)*up fused (SiLU on VPU/EUP under the MXU)."""
    xn = _rms(x_ref[...].astype(jnp.float32), g_ref[...].astype(jnp.float32), eps)
    xn = xn.astype(MXU_DTYPE)
    gate = jnp.dot(xn, wg_ref[...].astype(MXU_DTYPE), preferred_element_type=jnp.float32) \
        + bg_ref[...].astype(jnp.float32)
    up = jnp.dot(xn, wu_ref[...].astype(MXU_DTYPE), preferred_element_type=jnp.float32) \
        + bu_ref[...].astype(jnp.float32)
    o_ref[...] = (gate * lax.logistic(gate) * up).astype(o_ref.dtype)


def norm_gate_up_silu(x, norm_w, wg, bg, wu, bu, eps):
    M, K = x.shape
    N = wg.shape[1]
    tm = _pick_tile(M, 512, (256, 16, 8))
    tn = _pick_tile(N, 256, (256, 128))
    grid = (M // tm, N // tn)
    return pl.pallas_call(
        functools.partial(_norm_gate_up_silu_kernel, eps=eps),
        out_shape=jax.ShapeDtypeStruct((M, N), x.dtype),
        grid=grid,
        in_specs=[
            pl.BlockSpec((tm, K), lambda i, j: (i, 0)),
            pl.BlockSpec((1, K), lambda i, j: (0, 0)),
            pl.BlockSpec((K, tn), lambda i, j: (0, j)),
            pl.BlockSpec((K, tn), lambda i, j: (0, j)),
            pl.BlockSpec((1, tn), lambda i, j: (0, j)),
            pl.BlockSpec((1, tn), lambda i, j: (0, j)),
        ],
        out_specs=pl.BlockSpec((tm, tn), lambda i, j: (i, j)),
        compiler_params=_mosaic_params(("parallel", "parallel")),
    )(x, norm_w.reshape(1, K), wg, wu, bg.reshape(1, N), bu.reshape(1, N))


def _flash_attn_kernel(q_ref, k_ref, v_ref, o_ref, m_sc, l_sc, acc_sc,
                       *, scale, n_heads, n_kv, head_dim):
    """Online-softmax attention on the packed (seq, heads*Dh) layout.

    All heads are processed per grid step (static loop); GQA query heads share the resident
    K/V lane slice (no repeat copies); the finalize re-packs heads lane-dense via concat so
    the output store is a single wide vst.
    """
    tq = q_ref.shape[1]
    tkv = k_ref.shape[1]
    qi = pl.program_id(1)
    ki = pl.program_id(2)
    n_rep = n_heads // n_kv
    Dh = head_dim

    @pl.when(ki == 0)
    def _():
        m_sc[...] = jnp.full_like(m_sc, -jnp.inf)
        l_sc[...] = jnp.zeros_like(l_sc)
        acc_sc[...] = jnp.zeros_like(acc_sc)

    # Causal: skip compute for KV tiles entirely after the last query position of this tile.
    # (their DMA is also elided because the K/V index_map clamps the block index.)
    @pl.when(ki * tkv <= qi * tq + (tq - 1))
    def _():
        # causal mask generated in-kernel; shared by all heads; kept in f32.
        q_pos = qi * tq + lax.broadcasted_iota(jnp.int32, (tq, tkv), 0)
        k_pos = ki * tkv + lax.broadcasted_iota(jnp.int32, (tq, tkv), 1)
        causal = q_pos >= k_pos

        for kvh in range(n_kv):
            k_h = k_ref[0, :, kvh * Dh:(kvh + 1) * Dh].astype(MXU_DTYPE)   # (tkv, Dh)
            v_h = v_ref[0, :, kvh * Dh:(kvh + 1) * Dh].astype(MXU_DTYPE)   # (tkv, Dh)
            for r in range(n_rep):
                h = kvh * n_rep + r
                q_h = q_ref[0, :, h * Dh:(h + 1) * Dh].astype(MXU_DTYPE)   # (tq, Dh)
                # contract on Dh without transposing K.
                s = lax.dot_general(q_h, k_h, (((1,), (1,)), ((), ())),
                                    preferred_element_type=jnp.float32) * scale
                s = jnp.where(causal, s, -1e30)

                m_prev = m_sc[:, h:h + 1]
                m_new = jnp.maximum(m_prev, jnp.max(s, axis=-1, keepdims=True))
                alpha = jnp.exp(m_prev - m_new)
                p = jnp.exp(s - m_new)
                l_sc[:, h:h + 1] = alpha * l_sc[:, h:h + 1] \
                    + jnp.sum(p, axis=-1, keepdims=True)
                acc_sc[:, h * Dh:(h + 1) * Dh] = alpha * acc_sc[:, h * Dh:(h + 1) * Dh] \
                    + jnp.dot(p.astype(MXU_DTYPE), v_h, preferred_element_type=jnp.float32)
                m_sc[:, h:h + 1] = m_new

    @pl.when(ki == pl.num_programs(2) - 1)
    def _():
        pieces = []
        for h in range(n_heads):
            inv_l = pl.reciprocal(l_sc[:, h:h + 1], approx=True)   # EUP slot is idle here
            pieces.append(acc_sc[:, h * Dh:(h + 1) * Dh] * inv_l)
        o_ref[0] = jnp.concatenate(pieces, axis=-1).astype(o_ref.dtype)   # lane-dense store


def flash_attention(q, k, v, *, scale, n_heads, n_kv, head_dim):
    """q: (B, S, nH*Dh); k, v: (B, S, nKV*Dh) -> (B, S, nH*Dh). Packed layout, no transposes."""
    B, S, Hq = q.shape
    Hkv = k.shape[-1]
    tq = _pick_tile(S, 128, (8,))
    tkv = tq     # equal tiles keep every visited tile's rows partially unmasked (causal).
    grid = (B, S // tq, S // tkv)

    def kv_index(b, qi, ki):
        # Clamp to the last causally-needed tile: skipped steps reuse the resident block
        # (same block index -> no DMA), roughly halving K/V HBM traffic at long S.
        last_valid = (qi * tq + (tq - 1)) // tkv
        return (b, jnp.minimum(ki, last_valid), 0)

    return pl.pallas_call(
        functools.partial(_flash_attn_kernel, scale=scale, n_heads=n_heads,
                          n_kv=n_kv, head_dim=head_dim),
        out_shape=jax.ShapeDtypeStruct((B, S, Hq), q.dtype),
        grid=grid,
        in_specs=[
            pl.BlockSpec((1, tq, Hq), lambda b, qi, ki: (b, qi, 0)),
            pl.BlockSpec((1, tkv, Hkv), kv_index),
            pl.BlockSpec((1, tkv, Hkv), kv_index),
        ],
        out_specs=pl.BlockSpec((1, tq, Hq), lambda b, qi, ki: (b, qi, 0)),
        scratch_shapes=[
            pltpu.VMEM((tq, n_heads), jnp.float32),              # running max m (per head)
            pltpu.VMEM((tq, n_heads), jnp.float32),              # running denom l (per head)
            pltpu.VMEM((tq, n_heads * head_dim), jnp.float32),   # lane-packed accumulator
        ],
        compiler_params=_mosaic_params(("parallel", "parallel", "arbitrary")),
    )(q, k, v)


# -------------------------------- JAX glue -----------------------------------

def rope_cos_sin(seq_len, head_dim, base):
    inv_freq = 1.0 / (base ** (jnp.arange(0, head_dim, 2, dtype=jnp.float32) / head_dim))
    pos = jnp.arange(seq_len, dtype=jnp.float32)
    freqs = pos[:, None] * inv_freq[None, :]             # (S, D/2)
    emb = jnp.concatenate([freqs, freqs], axis=-1)       # (S, D)
    return jnp.cos(emb), jnp.sin(emb)


def attention_forward(p, x2, norm1_w, cfg, b, s):
    """x2: (b*s, H) packed. Returns the post-attention residual (x + o_proj(attn)), packed."""
    nH, nKV, Dh = cfg["n_heads"], cfg["n_kv_heads"], cfg["head_dim"]
    eps = cfg["rms_norm_eps"]

    cos, sin = rope_cos_sin(s, Dh, cfg["rope_theta"])    # (s, Dh) f32
    cos_flat = jnp.tile(cos, (b, 1))                     # row r -> position r % s
    sin_flat = jnp.tile(sin, (b, 1))

    # norm1 + Q/K/V + RoPE in one kernel; outputs stay in the packed layout.
    q2, k2, v2 = norm_qkv_rope(x2, norm1_w, p["q_w"], p["q_b"], p["k_w"], p["k_b"],
                               p["v_w"], p["v_b"], cos_flat, sin_flat, eps, nH, nKV, Dh)

    q = q2.reshape(b, s, nH * Dh)     # pure reshapes: no data movement
    k = k2.reshape(b, s, nKV * Dh)
    v = v2.reshape(b, s, nKV * Dh)
    attn = flash_attention(q, k, v, scale=Dh ** (-0.5), n_heads=nH, n_kv=nKV, head_dim=Dh)

    # o_proj with the `x + attention(...)` residual fused into the matmul epilogue.
    return linear(attn.reshape(-1, nH * Dh), p["o_w"], p["o_b"], residual=x2)


def gpt_block_forward(p, x, cfg):
    b, s, H = x.shape
    eps = cfg["rms_norm_eps"]
    x2 = x.reshape(-1, H)
    residual = attention_forward(p["attn"], x2, p["norm1_w"], cfg, b, s)   # (b*s, H)
    mlp = p["mlp"]
    h = norm_gate_up_silu(residual, p["norm2_w"], mlp["gate_w"], mlp["gate_b"],
                          mlp["up_w"], mlp["up_b"], eps)                   # norm2+gate/up+SiLU*up
    # down_proj with the second residual add fused into the epilogue.
    out = linear(h, mlp["down_w"], mlp["down_b"], residual=residual)
    return out.reshape(b, s, H)


def mtp_sub_forward(p, hidden_states, inputs_embeds, cfg):
    b, s, H = hidden_states.shape
    # norm(hs), norm(ie), concat, Linear(2H -> H)  ==  split-K fused kernel (no concat in HBM).
    proj = norm_concat_linear(
        hidden_states.reshape(-1, H), inputs_embeds.reshape(-1, H),
        p["norm_w"], p["lin_w_hs"], p["lin_w_ie"], p["lin_b"],
        cfg["rms_norm_eps"]).reshape(b, s, H)
    return gpt_block_forward(p["block"], proj, cfg)


def mtp_forward(params, hidden_states, inputs_embeds, lm_head_w, lm_head_b, cfg):
    _, seq_len, H = hidden_states.shape
    P = cfg["num_additional_preds"]
    logits_list = []
    for k in range(1, P + 1):
        start = k
        end = start + seq_len - P
        hs = hidden_states[:, start:end, :]
        ie = inputs_embeds[:, start:end, :]
        hidden_states = mtp_sub_forward(params["mtps"][k - 1], hs, ie, cfg)
        bb, ss, _ = hidden_states.shape
        logits = linear(hidden_states.reshape(-1, H), lm_head_w, lm_head_b).reshape(bb, ss, -1)
        logits_list.append(logits)
    return hidden_states, logits_list


# ----------------------------- parameter creation -----------------------------

def init_params(key, cfg):
    H = cfg["hidden_size"]
    I = cfg["intermediate_size"]
    nH, nKV, Dh = cfg["n_heads"], cfg["n_kv_heads"], cfg["head_dim"]

    def dense(k, fan_in, fan_out):
        kw, kb = jax.random.split(k)
        # weights stored bf16 (native MXU dtype, half the weight DMA); biases stay f32.
        w = (jax.random.normal(kw, (fan_in, fan_out), jnp.float32) * 0.02).astype(MXU_DTYPE)
        b = jax.random.normal(kb, (fan_out,), jnp.float32) * 0.01
        return w, b

    mtps = []
    for sk in jax.random.split(key, cfg["num_additional_preds"]):
        ks = jax.random.split(sk, 8)
        qw, qb = dense(ks[0], H, nH * Dh)
        kw_, kb_ = dense(ks[1], H, nKV * Dh)
        vw, vb = dense(ks[2], H, nKV * Dh)
        ow, ob = dense(ks[3], nH * Dh, H)
        gw, gb = dense(ks[4], H, I)
        uw, ub = dense(ks[5], H, I)
        dw, db = dense(ks[6], I, H)
        lw, lb = dense(ks[7], 2 * H, H)
        mtps.append({
            "norm_w": jnp.ones((H,), jnp.float32),
            # split-K halves of the (2H, H) MTPSub linear (top rows act on norm(hs), bottom on norm(ie))
            "lin_w_hs": lw[:H], "lin_w_ie": lw[H:], "lin_b": lb,
            "block": {
                "norm1_w": jnp.ones((H,), jnp.float32),
                "norm2_w": jnp.ones((H,), jnp.float32),
                "attn": {"q_w": qw, "q_b": qb, "k_w": kw_, "k_b": kb_,
                         "v_w": vw, "v_b": vb, "o_w": ow, "o_b": ob},
                "mlp": {"gate_w": gw, "gate_b": gb, "up_w": uw, "up_b": ub,
                        "down_w": dw, "down_b": db},
            },
        })
    return {"mtps": mtps}


# ----------------------------------- main --------------------------------------

if __name__ == "__main__":
    cfg = dict(
        hidden_size=32,
        n_heads=4,
        n_kv_heads=2,
        head_dim=8,                 # hidden_size // n_heads
        intermediate_size=64,
        vocab_size=64,
        num_additional_preds=1,     # reference slicing is only shape-consistent for 1
        rope_theta=10000.0,
        rms_norm_eps=1e-8,          # matches the default eps of every RMSNorm actually applied
    )

    key = jax.random.PRNGKey(0)
    k_p, k_h, k_e, k_lm = jax.random.split(key, 4)

    params = init_params(k_p, cfg)

    B, S, H = 2, 8, cfg["hidden_size"]
    hidden_states = jax.random.normal(k_h, (B, S, H), jnp.float32)
    inputs_embeds = jax.random.normal(k_e, (B, S, H), jnp.float32)
    lm_head_w = (jax.random.normal(k_lm, (H, cfg["vocab_size"]), jnp.float32) * 0.02).astype(MXU_DTYPE)
    lm_head_b = jnp.zeros((cfg["vocab_size"],), jnp.float32)

    out_hidden, logits_list = mtp_forward(
        params, hidden_states, inputs_embeds, lm_head_w, lm_head_b, cfg)

    jax.block_until_ready(out_hidden)
    for lg in logits_list:
        jax.block_until_ready(lg)

    print("KERNEL_OK")
</pallas_src>

<mosaic_0001>
module attributes {stable_mosaic.version = 11 : i64} {
  func.func @_norm_concat_linear_kernel(%arg0: i32, %arg1: i32, %arg2: memref<14x32xf32, #tpu.memory_space<vmem>>, %arg3: memref<14x32xf32, #tpu.memory_space<vmem>>, %arg4: memref<1x32xf32, #tpu.memory_space<vmem>>, %arg5: memref<32x32xbf16, #tpu.memory_space<vmem>>, %arg6: memref<32x32xbf16, #tpu.memory_space<vmem>>, %arg7: memref<1x32xf32, #tpu.memory_space<vmem>>, %arg8: memref<14x32xf32, #tpu.memory_space<vmem>>) attributes {dimension_semantics = [#tpu.dimension_semantics<parallel>, #tpu.dimension_semantics<parallel>], iteration_bounds = array<i64: 1, 1>, scalar_prefetch = 0 : i64, scratch_operands = 0 : i64, tpu.core_type = #tpu.core_type<tc>, window_params = [{transform_indices = @transform_0, window_bounds = array<i64: 14, 32>}, {transform_indices = @transform_1, window_bounds = array<i64: 14, 32>}, {pipeline_mode = #tpu.pipeline_mode<synchronous>, transform_indices = @transform_2, window_bounds = array<i64: 1, 32>}, {transform_indices = @transform_3, window_bounds = array<i64: 32, 32>}, {transform_indices = @transform_4, window_bounds = array<i64: 32, 32>}, {transform_indices = @transform_5, window_bounds = array<i64: 1, 32>}, {transform_indices = @transform_6, window_bounds = array<i64: 14, 32>}]} {
    %c0 = arith.constant 0 : index
    %c0_0 = arith.constant 0 : index
    %0 = vector.load %arg4[%c0, %c0_0] : memref<1x32xf32, #tpu.memory_space<vmem>>, vector<1x32xf32>
    %c0_1 = arith.constant 0 : index
    %c0_2 = arith.constant 0 : index
    %1 = vector.load %arg2[%c0_1, %c0_2] : memref<14x32xf32, #tpu.memory_space<vmem>>, vector<14x32xf32>
    %2 = arith.mulf %1, %1 : vector<14x32xf32>
    %cst = arith.constant dense<0.000000e+00> : vector<14xf32>
    %3 = vector.multi_reduction <add>, %2, %cst [1] : vector<14x32xf32> to vector<14xf32>
    %4 = vector.shape_cast %3 : vector<14xf32> to vector<14x1xf32>
    %cst_3 = arith.constant 3.200000e+01 : f32
    %5 = vector.broadcast %cst_3 : f32 to vector<14x1xf32>
    %6 = arith.divf %4, %5 : vector<14x1xf32>
    %cst_4 = arith.constant 9.99999993E-9 : f32
    %7 = vector.broadcast %cst_4 : f32 to vector<14x1xf32>
    %8 = arith.addf %6, %7 : vector<14x1xf32>
    %9 = math.rsqrt %8 : vector<14x1xf32>
    %10 = vector.broadcast %9 : vector<14x1xf32> to vector<14x32xf32>
    %11 = arith.mulf %1, %10 : vector<14x32xf32>
    %12 = vector.broadcast %0 : vector<1x32xf32> to vector<14x32xf32>
    %13 = arith.mulf %11, %12 : vector<14x32xf32>
    %14 = arith.truncf %13 : vector<14x32xf32> to vector<14x32xbf16>
    %c0_5 = arith.constant 0 : index
    %c0_6 = arith.constant 0 : index
    %15 = vector.load %arg3[%c0_5, %c0_6] : memref<14x32xf32, #tpu.memory_space<vmem>>, vector<14x32xf32>
    %16 = arith.mulf %15, %15 : vector<14x32xf32>
    %cst_7 = arith.constant dense<0.000000e+00> : vector<14xf32>
    %17 = vector.multi_reduction <add>, %16, %cst_7 [1] : vector<14x32xf32> to vector<14xf32>
    %18 = vector.shape_cast %17 : vector<14xf32> to vector<14x1xf32>
    %cst_8 = arith.constant 3.200000e+01 : f32
    %19 = vector.broadcast %cst_8 : f32 to vector<14x1xf32>
    %20 = arith.divf %18, %19 : vector<14x1xf32>
    %cst_9 = arith.constant 9.99999993E-9 : f32
    %21 = vector.broadcast %cst_9 : f32 to vector<14x1xf32>
    %22 = arith.addf %20, %21 : vector<14x1xf32>
    %23 = math.rsqrt %22 : vector<14x1xf32>
    %24 = vector.broadcast %23 : vector<14x1xf32> to vector<14x32xf32>
    %25 = arith.mulf %15, %24 : vector<14x32xf32>
    %26 = vector.broadcast %0 : vector<1x32xf32> to vector<14x32xf32>
    %27 = arith.mulf %25, %26 : vector<14x32xf32>
    %28 = arith.truncf %27 : vector<14x32xf32> to vector<14x32xbf16>
    %c0_10 = arith.constant 0 : index
    %c0_11 = arith.constant 0 : index
    %29 = vector.load %arg5[%c0_10, %c0_11] : memref<32x32xbf16, #tpu.memory_space<vmem>>, vector<32x32xbf16>
    %cst_12 = arith.constant dense<0.000000e+00> : vector<14x32xf32>
    %30 = tpu.matmul %14, %29, %cst_12 {dimension_numbers = #tpu.dot_dimension_numbers<[1], [0], [0], [1], [0, 0, 1, 1], [], []>} : vector<14x32xbf16>, vector<32x32xbf16>, vector<14x32xf32> -> vector<14x32xf32>
    %c0_13 = arith.constant 0 : index
    %c0_14 = arith.constant 0 : index
    %31 = vector.load %arg6[%c0_13, %c0_14] : memref<32x32xbf16, #tpu.memory_space<vmem>>, vector<32x32xbf16>
    %cst_15 = arith.constant dense<0.000000e+00> : vector<14x32xf32>
    %32 = tpu.matmul %28, %31, %cst_15 {dimension_numbers = #tpu.dot_dimension_numbers<[1], [0], [0], [1], [0, 0, 1, 1], [], []>} : vector<14x32xbf16>, vector<32x32xbf16>, vector<14x32xf32> -> vector<14x32xf32>
    %33 = arith.addf %30, %32 : vector<14x32xf32>
    %c0_16 = arith.constant 0 : index
    %c0_17 = arith.constant 0 : index
    %34 = vector.load %arg7[%c0_16, %c0_17] : memref<1x32xf32, #tpu.memory_space<vmem>>, vector<1x32xf32>
    %35 = vector.broadcast %34 : vector<1x32xf32> to vector<14x32xf32>
    %36 = arith.addf %33, %35 : vector<14x32xf32>
    %c0_18 = arith.constant 0 : index
    %c0_19 = arith.constant 0 : index
    %37 = vector.load %arg8[%c0_18, %c0_19] : memref<14x32xf32, #tpu.memory_space<vmem>>, vector<14x32xf32>
    tpu.vector_store %arg8[%c0_18, %c0_19], %36 {strides = array<i32>} : memref<14x32xf32, #tpu.memory_space<vmem>>, vector<14x32xf32>,
    return
  }
  func.func @transform_0(%arg0: i32, %arg1: i32) -> (i32, i32) {
    %c0_i32 = arith.constant 0 : i32
    %c0_i32_0 = arith.constant 0 : i32
    return %arg0, %c0_i32 : i32, i32
  }
  func.func @transform_1(%arg0: i32, %arg1: i32) -> (i32, i32) {
    %c0_i32 = arith.constant 0 : i32
    %c0_i32_0 = arith.constant 0 : i32
    return %arg0, %c0_i32 : i32, i32
  }
  func.func @transform_2(%arg0: i32, %arg1: i32) -> (i32, i32) {
    %c0_i32 = arith.constant 0 : i32
    %c0_i32_0 = arith.constant 0 : i32
    %c0_i32_1 = arith.constant 0 : i32
    return %c0_i32, %c0_i32_0 : i32, i32
  }
  func.func @transform_3(%arg0: i32, %arg1: i32) -> (i32, i32) {
    %c0_i32 = arith.constant 0 : i32
    %c0_i32_0 = arith.constant 0 : i32
    return %c0_i32, %arg1 : i32, i32
  }
  func.func @transform_4(%arg0: i32, %arg1: i32) -> (i32, i32) {
    %c0_i32 = arith.constant 0 : i32
    %c0_i32_0 = arith.constant 0 : i32
    return %c0_i32, %arg1 : i32, i32
  }
  func.func @transform_5(%arg0: i32, %arg1: i32) -> (i32, i32) {
    %c0_i32 = arith.constant 0 : i32
    %c0_i32_0 = arith.constant 0 : i32
    return %c0_i32, %arg1 : i32, i32
  }
  func.func @transform_6(%arg0: i32, %arg1: i32) -> (i32, i32) {
    %c0_i32 = arith.constant 0 : i32
    return %arg0, %arg1 : i32, i32
  }
}

</mosaic_0001>

<bundles_post_ra>
// kernel: tpu_custom_call.1
= control target key start
LH: loop header
LB: loop body
LE: loop exit
PB: predicated region body
PF: predicated region fallthrough
CT: control target
= control target key end

     0   :  { %11 = vsyncpa [#allocation3], 0  ;;  %s687_s0 = inlined_call_operand.hbm [shape: f32[14,32], index: 0, kind: input, shape index: {}]   ;;  %s688_s1 = inlined_call_operand.hbm [shape: f32[14,32], index: 1, kind: input, shape index: {}]   ;;  %s689_s2 = inlined_call_operand.hbm [shape: f32[1,32], index: 2, kind: input, shape index: {}]   ;;  %s690_s3 = inlined_call_operand.hbm [shape: bf16[32,32], index: 3, kind: input, shape index: {}]   ;;  %s691_s4 = inlined_call_operand.hbm [shape: bf16[32,32], index: 4, kind: input, shape index: {}]   ;;  %s692_s5 = inlined_call_operand.hbm [shape: f32[1,32], index: 5, kind: input, shape index: {}]   ;;  %s693_s6 = inlined_call_operand.hbm [shape: f32[14,32], index: 6, kind: output, shape index: {}]  }
   0x1   :  { %12 = vsyncpa [#allocation6], 0 }
   0x2   :  { %13 = vsyncpa [#allocation9], 0 }
   0x3   :  { %14 = vsyncpa [#allocation12], 0 }
   0x4   :  { %15 = vsyncpa [#allocation4], 0  ;;  %s525_s21 = smov [#allocation5]   ;;  %s526_s23 = smov [#allocation8]  }
   0x5   :  { %s33_s22 = sshll.u32 %s525_s21, 4  ;;  %s55_s24 = sshll.u32 %s526_s23, 4  ;;  %s34_s22 = int_to_ptr.vmem [resolvable:$true] %s33_s22  ;;  %s573_s24 = int_to_ptr.vmem [resolvable:$true] %s55_s24 }
   0x6   :  { %s361_s27 = scalar_lea.hbm %s688_s1, 256 }
   0x7   :  { %p362_p0 = scmp.ne.s32.totalorder %s688_s1, %s361_s27  ;;  %p365_p1 = scmp.lt.u32.totalorder %s361_s27, %s688_s1 }
   0x9   :  { %p367_p2 = pnand %p365_p1, %p362_p0 }
   0xb   :  { %370 = shalt.err (!%p367_p2)
}
   0xc   :  { %s371_s8 = scalar_lea.vmem %s34_s22, 256  ;;  %p376_p4 = scmp.lt.s32.totalorder %s34_s22, %s34_s22 }
   0xd   :  { %p372_p3 = scmp.ne.s32.totalorder %s34_s22, %s371_s8  ;;  %p377_p5 = scmp.lt.s32.totalorder %s371_s8, %s371_s8 }
   0xf   :  { %p378_p6 = por %p377_p5, %p376_p4 }
  0x11   :  { %p379_p7 = pnand %p378_p6, %p372_p3 }
  0x13   :  { %382 = shalt.err (!%p379_p7)
}
  0x14   :  { %s527_s9 = smov 128   ;;  %s528_s10 = smov 8  }
  0x15   :  { %39 = dma.hbm_to_vmem [thread:$0]  %s688_s1, 256, %s34_s22, [#allocation6], %s527_s9, %s527_s9, %s528_s10  }
  0x16   :  { %s383_s15 = scalar_lea.hbm %s690_s3, 256 }
  0x17   :  { %p384_p8 = scmp.ne.s32.totalorder %s690_s3, %s383_s15  ;;  %p387_p9 = scmp.lt.u32.totalorder %s383_s15, %s690_s3 }
  0x19   :  { %p389_p10 = pnand %p387_p9, %p384_p8 }
  0x1b   :  { %392 = shalt.err (!%p389_p10)
}
  0x1c   :  { %s393_s20 = scalar_lea.vmem %s573_s24, 256  ;;  %p398_p12 = scmp.lt.s32.totalorder %s573_s24, %s573_s24 }
  0x1d   :  { %p394_p11 = scmp.ne.s32.totalorder %s573_s24, %s393_s20  ;;  %p399_p13 = scmp.lt.s32.totalorder %s393_s20, %s393_s20 }
  0x1f   :  { %p400_p0 = por %p399_p13, %p398_p12 }
  0x21   :  { %p401_p1 = pnand %p400_p0, %p394_p11 }
  0x23   :  { %404 = shalt.err (!%p401_p1)
}
  0x24   :  { %s529_s1 = smov 64   ;;  %s530_s21 = smov 4  }
  0x25   :  { %61 = dma.hbm_to_vmem [thread:$0]  %s690_s3, 256, %s573_s24, [#allocation9], %s529_s1, %s529_s1, %s530_s21  }
  0x26   :  { %s531_s25 = smov [#allocation2]   ;;  %s532_s27 = smov [#allocation7]  }
  0x27   :  { %s21_s26 = sshll.u32 %s531_s25, 4  ;;  %s46_s28 = sshll.u32 %s532_s27, 4  ;;  %s22_s26 = int_to_ptr.vmem [resolvable:$true] %s21_s26  ;;  %s47_s28 = int_to_ptr.vmem [resolvable:$true] %s46_s28 }
  0x28   :  { %s405_s7 = scalar_lea.hbm %s687_s0, 256 }
  0x29   :  { %p406_p2 = scmp.ne.s32.totalorder %s687_s0, %s405_s7  ;;  %p409_p3 = scmp.lt.u32.totalorder %s405_s7, %s687_s0 }
  0x2b   :  { %p411_p4 = pnand %p409_p3, %p406_p2 }
  0x2d   :  { %414 = shalt.err (!%p411_p4)
}
  0x2e   :  { %s415_s3 = scalar_lea.vmem %s22_s26, 256  ;;  %p420_p6 = scmp.lt.s32.totalorder %s22_s26, %s22_s26 }
  0x2f   :  { %p416_p5 = scmp.ne.s32.totalorder %s22_s26, %s415_s3  ;;  %p421_p7 = scmp.lt.s32.totalorder %s415_s3, %s415_s3 }
  0x31   :  { %p422_p8 = por %p421_p7, %p420_p6 }
  0x33   :  { %p423_p9 = pnand %p422_p8, %p416_p5 }
  0x35   :  { %426 = shalt.err (!%p423_p9)
}
  0x36   :  { %27 = dma.hbm_to_vmem [thread:$0]  %s687_s0, 256, %s22_s26, [#allocation3], %s527_s9, %s527_s9, %s528_s10  }
  0x37   :  { %s427_s17 = scalar_lea.hbm %s689_s2, 16 }
  0x38   :  { %p428_p10 = scmp.ne.s32.totalorder %s689_s2, %s427_s17  ;;  %p431_p11 = scmp.lt.u32.totalorder %s427_s17, %s689_s2 }
  0x3a   :  { %p433_p12 = pnand %p431_p11, %p428_p10 }
  0x3c   :  { %436 = shalt.err (!%p433_p12)
}
  0x3d   :  { %s437_s23 = scalar_lea.vmem %s47_s28, 16  ;;  %s441_s25 = scalar_lea.vmem %s47_s28, 32 }
  0x3e   :  { %p438_p13 = scmp.ne.s32.totalorder %s47_s28, %s437_s23  ;;  %p442_p0 = scmp.lt.s32.totalorder %s47_s28, %s47_s28 }
  0x3f   :  { %p443_p1 = scmp.lt.s32.totalorder %s441_s25, %s437_s23 }
  0x41   :  { %p444_p2 = por %p443_p1, %p442_p0 }
  0x43   :  { %p445_p3 = pnand %p444_p2, %p438_p13 }
  0x45   :  { %448 = shalt.err (!%p445_p3)
}
  0x46   :  { %49 = dma.hbm_to_vmem [thread:$0]  %s689_s2, 16, %s47_s28, [#allocation6]  }
  0x47   :  { %s533_s27 = smov [#allocation10]   ;;  %s534_s30 = smov [#allocation11]  }
  0x48   :  { %s67_s29 = sshll.u32 %s533_s27, 4  ;;  %s80_s7 = sshll.u32 %s534_s30, 4  ;;  %s68_s29 = int_to_ptr.vmem [resolvable:$true] %s67_s29  ;;  %s81_s7 = int_to_ptr.vmem [resolvable:$true] %s80_s7 }
  0x49   :  { %s449_s12 = scalar_lea.hbm %s691_s4, 256 }
  0x4a   :  { %p450_p4 = scmp.ne.s32.totalorder %s691_s4, %s449_s12  ;;  %p453_p5 = scmp.lt.u32.totalorder %s449_s12, %s691_s4 }
  0x4c   :  { %p455_p6 = pnand %p453_p5, %p450_p4 }
  0x4e   :  { %458 = shalt.err (!%p455_p6)
}
  0x4f   :  { %s459_s2 = scalar_lea.vmem %s68_s29, 256  ;;  %p464_p8 = scmp.lt.s32.totalorder %s68_s29, %s68_s29 }
  0x50   :  { %p460_p7 = scmp.ne.s32.totalorder %s68_s29, %s459_s2  ;;  %p465_p9 = scmp.lt.s32.totalorder %s459_s2, %s459_s2 }
  0x52   :  { %p466_p10 = por %p465_p9, %p464_p8 }
  0x54   :  { %p467_p11 = pnand %p466_p10, %p460_p7 }
  0x56   :  { %470 = shalt.err (!%p467_p11)
}
  0x57   :  { %73 = dma.hbm_to_vmem [thread:$0]  %s691_s4, 256, %s68_s29, [#allocation9], %s529_s1, %s529_s1, %s530_s21  }
  0x58   :  { %s471_s18 = scalar_lea.hbm %s692_s5, 16 }
  0x59   :  { %p472_p12 = scmp.ne.s32.totalorder %s692_s5, %s471_s18  ;;  %p475_p13 = scmp.lt.u32.totalorder %s471_s18, %s692_s5 }
  0x5b   :  { %p477_p0 = pnand %p475_p13, %p472_p12 }
  0x5d   :  { %480 = shalt.err (!%p477_p0)
}
  0x5e   :  { %s481_s25 = scalar_lea.vmem %s81_s7, 16  ;;  %s485_s0 = scalar_lea.vmem %s81_s7, 32 }
  0x5f   :  { %p482_p1 = scmp.ne.s32.totalorder %s81_s7, %s481_s25  ;;  %p486_p2 = scmp.lt.s32.totalorder %s81_s7, %s81_s7 }
  0x60   :  { %p487_p3 = scmp.lt.s32.totalorder %s485_s0, %s481_s25 }
  0x62   :  { %p488_p4 = por %p487_p3, %p486_p2 }
  0x64   :  { %p489_p5 = pnand %p488_p4, %p482_p1 }
  0x66   :  { %492 = shalt.err (!%p489_p5)
}
  0x67   :  { %83 = dma.hbm_to_vmem [thread:$0]  %s692_s5, 16, %s81_s7, [#allocation12]  }
  0x68   :  { %515 = dma.done.wait [#allocation3], 256  }
  0x69   :  { %516 = vsyncadd [#allocation3], 4294967040 }
  0x6a   :  { %517 = dma.done.wait [#allocation6], 272  }
  0x6b   :  { %518 = vsyncadd [#allocation6], 4294967024 }
  0x6c   :  { %519 = dma.done.wait [#allocation9], 512  }
  0x6d   :  { %520 = vsyncadd [#allocation9], 4294966784 }
  0x6e   :  { %521 = dma.done.wait [#allocation12], 16  }
  0x6f   :  { %522 = vsyncadd [#allocation12], 4294967280  ;;  %vm108_vm0 = vcmask 261120   ;;  %v134_v0 = vld [vmem:[#allocation5] sm:$0xff]  ;;  %v104_v1 = vld [vmem:[#allocation2] sm:$0xff]  ;;  %vm112_vm1 = vcmask 259072  }
  0x70   :  { %v135_v2 = vld [vmem:[#allocation5 + $0x8] sm:$0x3f]  ;;  %v136_v3 = vmul.f32 %v134_v0, %v134_v0  ;;  %v106_v4 = vmul.f32 %v104_v1, %v104_v1  ;;  %v105_v6 = vld [vmem:[#allocation2 + $0x8] sm:$0x3f]  ;;  %v535_v14 = vmov 0.0   ;;  %vm536_vm2 = vmmov 0  }
  0x71   :  { %v137_v5 = vmul.f32 %v135_v2, %v135_v2  ;;  %v107_v7 = vmul.f32 %v105_v6, %v105_v6  ;;  %v349_v12 = vld [vmem:[#allocation10] sm:$0xff]   ;;  %v350_v13 = vld [vmem:[#allocation8] sm:$0xff]   ;;  %320 = vmatprep.subr.bf16.mxu0 %v535_v14  ;;  %328 = vmatprep.subr.bf16.mxu1 %v535_v14  ;;  %v351_v15 = vld [vmem:[#allocation10 + $0x8] sm:$0xff]   ;;  %s537_s5 = smov [#allocation13]  }
  0x72   :  { %v138_v8 = vsel %vm108_vm0, %v136_v3, 0.0  ;;  %v109_v9 = vsel %vm108_vm0, %v106_v4, 0.0  ;;  %321 = vmatpush3.bf16.msra.mxu0 %v349_v12  ;;  %329 = vmatpush3.bf16.msra.mxu1 %v350_v13  ;;  %v352_v16 = vld [vmem:[#allocation8 + $0x8] sm:$0xff]   ;;  %v306_v33 = vld [vmem:[#allocation7] ss:$0 sm:$0xff]  ;;  %s291_s21 = sshll.u32 %s537_s5, 4  ;;  %s292_s21 = int_to_ptr.vmem [resolvable:$true] %s291_s21 }
  0x73   :  { %139 = vadd.xlane.f32.xlu1 %v138_v8  ;;  %110 = vadd.xlane.f32.xlu0 %v109_v9  ;;  %v141_v10 = vsel %vm112_vm1, %v137_v5, 0.0  ;;  %v113_v11 = vsel %vm112_vm1, %v107_v7, 0.0  ;;  %v313_v46 = vld [vmem:[#allocation11] ss:$0 sm:$0xff]  ;;  %s493_s26 = scalar_lea.vmem %s292_s21, 256  ;;  %p498_p7 = scmp.lt.s32.totalorder %s292_s21, %s292_s21 }
  0x74   :  { %322 = vmatprep.subr.bf16.mxu0 %v535_v14  ;;  %330 = vmatprep.subr.bf16.mxu1 %v535_v14  ;;  %p494_p6 = scmp.ne.s32.totalorder %s292_s21, %s493_s26  ;;  %p499_p8 = scmp.lt.s32.totalorder %s493_s26, %s493_s26 }
  0x75   :  { %324 = vmatprep.mubr.msk.bf16.mxu0 %vm536_vm2, %v535_v14  ;;  %332 = vmatprep.mubr.msk.bf16.mxu1 %vm536_vm2, %v535_v14 }
  0x76   :  { %323 = vmatpush3.bf16.msra.mxu0 %v351_v15  ;;  %331 = vmatpush3.bf16.msra.mxu1 %v352_v16  ;;  %p500_p9 = por %p499_p8, %p498_p7 }
  0x77   :  { %142 = vadd.xlane.f32.xlu1 %v141_v10  ;;  %114 = vadd.xlane.f32.xlu0 %v113_v11 }
  0x78   :  { %p501_p10 = pnand %p500_p9, %p494_p6 }
 0x100   :  { %v140_v17 = vpop.xlane.xlu1 %139  ;;  %v111_v18 = vpop.xlane.xlu0 %110 }
 0x101   :  { %v144_v19 = vmul.f32 0.03125, %v140_v17  ;;  %v117_v20 = vmul.f32 0.03125, %v111_v18 }
 0x103   :  { %v146_v21 = vadd.f32 1e-08, %v144_v19  ;;  %v119_v22 = vadd.f32 1e-08, %v117_v20 }
 0x104   :  { %v143_v23 = vpop.xlane.xlu1 %142  ;;  %v115_v24 = vpop.xlane.xlu0 %114 }
 0x105   :  { %353 = vrsqrt.f32 %v146_v21  ;;  %v145_v25 = vmul.f32 0.03125, %v143_v23  ;;  %v118_v26 = vmul.f32 0.03125, %v115_v24 }
 0x106   :  { %355 = vrsqrt.f32 %v119_v22 }
 0x107   :  { %v147_v27 = vadd.f32 1e-08, %v145_v25  ;;  %v120_v28 = vadd.f32 1e-08, %v118_v26 }
 0x109   :  { %357 = vrsqrt.f32 %v147_v27 }
 0x10a   :  { %359 = vrsqrt.f32 %v120_v28 }
 0x10f   :  { %v354_v29 = vpop.eup %353 }
 0x110   :  { %v356_v30 = vpop.eup %355  ;;  %v150_v31 = vmul.f32 %v354_v29, %v134_v0 }
 0x111   :  { %v123_v34 = vmul.f32 %v356_v30, %v104_v1 }
 0x112   :  { %v152_v38 = vmul.f32 %v306_v33, %v150_v31 }
 0x113   :  { %v358_v32 = vpop.eup %357  ;;  %v131_v40 = vmul.f32 %v306_v33, %v123_v34 }
 0x114   :  { %v360_v35 = vpop.eup %359  ;;  %v151_v36 = vmul.f32 %v358_v32, %v135_v2 }
 0x115   :  { %v124_v37 = vmul.f32 %v360_v35, %v105_v6 }
 0x116   :  { %v153_v39 = vmul.f32 %v306_v33, %v151_v36 }
 0x117   :  { %v132_v41 = vmul.f32 %v306_v33, %v124_v37 }
 0x118   :  { %v154_v42 = vpack.c.bf16 %v153_v39, %v152_v38 }
 0x119   :  { %v133_v43 = vpack.c.bf16 %v132_v41, %v131_v40 }
 0x11a   :  { %325 = vmatmul.mubr.msk.bf16.vlgmr.msra.gmra.mrb[0].mxu0 %vm108_vm0, %v154_v42 }
 0x11b   :  { %333 = vmatmul.mubr.msk.bf16.vlgmr.msra.gmra.mrb[0].mxu1 %vm108_vm0, %v133_v43 }
 0x1ed   :  { %v212_v44 = vpop.f32.mrb[0].mxu0 }
 0x1ee   :  { %v268_v45 = vpop.f32.mrb[0].mxu1  ;;  %v326_v47 = vpop.f32.mrb[1].mxu0 }
 0x1ef   :  { %v269_v48 = vadd.f32 %v268_v45, %v212_v44  ;;  %v334_v49 = vpop.f32.mrb[1].mxu1  ;;  %v215_v50 = vpop.f32.mrb[2].mxu0 }
 0x1f0   :  { %v271_v51 = vpop.f32.mrb[2].mxu1  ;;  %v327_v52 = vpop.f32.mrb[3].mxu0 }
 0x1f1   :  { %v282_v53 = vadd.f32 %v313_v46, %v269_v48  ;;  %v272_v54 = vadd.f32 %v271_v51, %v215_v50  ;;  %v335_v55 = vpop.f32.mrb[3].mxu1 }
 0x1f3   :  { %284 = vst.msk [vmem:[#allocation13] sm:$0xff] %vm108_vm0, %v282_v53  ;;  %v283_v56 = vadd.f32 %v313_v46, %v272_v54 }
 0x1f5   :  { %285 = vst.msk [vmem:[#allocation13 + $0x8] sm:$0x3f] %vm112_vm1, %v283_v56 }
 0x1f6   :  { %504 = shalt.err (!%p501_p10)
}
 0x1f7   :  { %s505_s30 = scalar_lea.hbm %s693_s6, 256 }
 0x1f8   :  { %p506_p11 = scmp.ne.s32.totalorder %s693_s6, %s505_s30  ;;  %p509_p12 = scmp.lt.u32.totalorder %s505_s30, %s693_s6 }
 0x1fa   :  { %p511_p13 = pnand %p509_p12, %p506_p11 }
 0x1fc   :  { %514 = shalt.err (!%p511_p13)
}
 0x1fd   :  { %297 = dma.vmem_to_hbm [thread:$0]  %s292_s21, 256, %s693_s6, [#allocation4], %s527_s9, %s527_s9, %s528_s10  }
 0x1fe   :  { %523 = dma.done.wait [#allocation4], 256  }
 0x1ff   :  { %524 = vsyncadd [#allocation4], 4294967040 }
 0x200   :  { %301 = vsyncpa [#allocation3], 1 }
 0x201   :  { %302 = vsyncpa [#allocation6], 1 }
 0x202   :  { %303 = vsyncpa [#allocation9], 1 }
 0x203   :  { %304 = vsyncpa [#allocation12], 1 }
 0x204   :  { %305 = vsyncpa [#allocation4], 1 }

</bundles_post_ra>
